<compile_context>
chip_gen: v7x
topology: tpu7x:2x2x1
jax: 0.10.0
libtpu: 0.0.40
codegen_flags: <defaults>
</compile_context>

<pallas_src>
import jax
import jax.numpy as jnp
from jax.experimental import pallas as pl
from jax.experimental.pallas import tpu as pltpu


_VMEM_LIMIT = 48 * 1024 * 1024          # safe on v5e/v6e (128 MiB phys) and v7x (64 MiB phys)
_FUSED_EMBED_BYTES = 12 * 1024 * 1024   # fused path when embeds (+ temps) fit comfortably
_SCORE_TILE_BYTES = 2 * 1024 * 1024     # ~MiB-scale embed tile per grid step (kernel 1)
_COMBINE_STEP_BYTES = 8 * 1024 * 1024   # (P reads + 1 write) bytes per grid step (kernel 2)


# --------------------------------------------------------------------------------------
# Fused single-call path: embeds resident in VMEM, one HBM read of embeds total.
# --------------------------------------------------------------------------------------
def _make_fused_kernel(num_p, n_rows):
    inv_n = 1.0 / float(n_rows)

    def kernel(emb_ref, wt_ref, b_ref, att_ref, z_ref, beta_ref):
        # --- per-metapath scores: s_p = att . mean_n tanh(emb_p @ Wt + b) -------------
        scores = []
        for p in range(num_p):                                   # P is small & static
            x = emb_ref[p]                                       # (N, D)
            h = jnp.tanh(
                jnp.dot(x, wt_ref[...], preferred_element_type=jnp.float32)
                + b_ref[...])
            wa = h * att_ref[...]                                # (N, D)
            col = jnp.sum(wa, axis=0, keepdims=True)             # (1, D)
            scores.append(jnp.sum(col, axis=1, keepdims=True) * inv_n)  # (1, 1)

        # --- softmax over the P scores (pure elementwise ops on (1,1) tiles) ----------
        m = scores[0]
        for p in range(1, num_p):
            m = jnp.maximum(m, scores[p])
        exps = [jnp.exp(s - m) for s in scores]
        tot = exps[0]
        for p in range(1, num_p):
            tot = tot + exps[p]
        betas = [e / tot for e in exps]                          # (1, 1) each

        # --- weighted sum over metapaths: single lane-dense write ---------------------
        acc = emb_ref[0] * betas[0]
        for p in range(1, num_p):
            acc = acc + emb_ref[p] * betas[p]
        z_ref[...] = acc

        # --- emit beta into the first P lanes of a (1, 128) output vector -------------
        lane = jax.lax.broadcasted_iota(jnp.int32, (1, 128), 1)
        bvec = jnp.zeros((1, 128), jnp.float32)
        for p in range(num_p):
            bvec = jnp.where(lane == p, jnp.broadcast_to(betas[p], (1, 128)), bvec)
        beta_ref[...] = bvec

    return kernel


def _attention_fused(embeds, wt, b2, att2):
    P, N, D = embeds.shape
    vmem = pl.BlockSpec(memory_space=pltpu.MemorySpace.VMEM)
    z, beta_vec = pl.pallas_call(
        _make_fused_kernel(P, N),
        out_shape=(jax.ShapeDtypeStruct((N, D), jnp.float32),
                   jax.ShapeDtypeStruct((1, 128), jnp.float32)),
        in_specs=[vmem, vmem, vmem, vmem],
        out_specs=(vmem, vmem),
        compiler_params=pltpu.CompilerParams(vmem_limit_bytes=_VMEM_LIMIT),
    )(embeds, wt, b2, att2)
    return z, beta_vec[0, :P]


# --------------------------------------------------------------------------------------
# Two-pass fallback for large inputs.
# --------------------------------------------------------------------------------------
def _make_score_partial_kernel(n_rows, tile_rows, ragged):
    """Writes the per-(metapath, row-tile) partial of sum_n sum_d h*att (no carry)."""

    def kernel(emb_ref, wt_ref, b_ref, att_ref, part_ref):
        x = emb_ref[0]                                           # (TN, D)
        h = jnp.tanh(
            jnp.dot(x, wt_ref[...], preferred_element_type=jnp.float32)
            + b_ref[...])
        wa = h * att_ref[...]                                    # (TN, D)
        if ragged:  # static: mask code only compiled in when N % tile_rows != 0
            n = pl.program_id(1)
            row = jax.lax.broadcasted_iota(jnp.int32, wa.shape, 0)
            wa = jnp.where(n * tile_rows + row < n_rows, wa, 0.0)
        part_ref[0, 0] = jnp.sum(wa, axis=0, keepdims=True)      # (1, D)

    return kernel


def _combine_kernel(beta_ref, emb_ref, z_ref):
    """Single-write weighted sum over the (tiny, static) metapath axis for one tile."""
    num_p = emb_ref.shape[0]
    acc = beta_ref[0] * emb_ref[0]
    for p in range(1, num_p):
        acc = acc + beta_ref[p] * emb_ref[p]
    z_ref[...] = acc


def _attention_two_pass(embeds, wt, b2, att2, *, score_tile_rows=None,
                        combine_tile_rows=None):
    P, N, D = embeds.shape

    # --- pass 1: per-(metapath, row-tile) partial scores -----------------------------
    if score_tile_rows is None:
        tn = min(N, max(8, (_SCORE_TILE_BYTES // (D * 4)) // 8 * 8))
    else:
        tn = min(N, score_tile_rows)
    nt = pl.cdiv(N, tn)
    ragged = (N % tn) != 0

    partials = pl.pallas_call(
        _make_score_partial_kernel(N, tn, ragged),
        out_shape=jax.ShapeDtypeStruct((P, nt, 1, D), jnp.float32),
        grid=(P, nt),
        in_specs=[
            pl.BlockSpec((1, tn, D), lambda p, n: (p, n, 0)),    # embeds tile (~2 MiB)
            pl.BlockSpec((D, D), lambda p, n: (0, 0)),           # Wt (resident)
            pl.BlockSpec((1, D), lambda p, n: (0, 0)),           # bias (resident)
            pl.BlockSpec((1, D), lambda p, n: (0, 0)),           # att  (resident)
        ],
        out_specs=pl.BlockSpec((1, 1, 1, D), lambda p, n: (p, n, 0, 0)),
        compiler_params=pltpu.CompilerParams(
            dimension_semantics=("parallel", "parallel"),        # megacore-safe on v7x
            vmem_limit_bytes=_VMEM_LIMIT,
        ),
    )(embeds, wt, b2, att2)

    scores = partials.sum(axis=(1, 2, 3)) * (1.0 / N)            # tiny reduce in JAX
    beta = jax.nn.softmax(scores)

    # --- pass 2: lane-dense weighted sum of metapath embeddings ----------------------
    total = N * D
    if total % 128 == 0:
        lanes, rows = 128, total // 128
        emb2 = embeds.reshape(P, rows, lanes)                    # contiguous: no copy
    else:
        # TODO(synk): when N*D % 128 != 0 the output last dim is D (if D < 128 this uses
        # masked stores); lane-dense repacking would require an extra HBM copy of embeds.
        lanes, rows = D, N
        emb2 = embeds

    if combine_tile_rows is None:
        tr = min(rows, max(8, (_COMBINE_STEP_BYTES // ((P + 1) * lanes * 4)) // 8 * 8))
    else:
        tr = min(rows, combine_tile_rows)
    rt = pl.cdiv(rows, tr)

    z_flat = pl.pallas_call(
        _combine_kernel,
        out_shape=jax.ShapeDtypeStruct((rows, lanes), jnp.float32),
        grid=(rt,),
        in_specs=[
            pl.BlockSpec(memory_space=pltpu.MemorySpace.SMEM),   # beta (P,) scalars
            pl.BlockSpec((P, tr, lanes), lambda r: (0, r, 0)),   # embeds tile
        ],
        out_specs=pl.BlockSpec((tr, lanes), lambda r: (r, 0)),   # one write per tile
        compiler_params=pltpu.CompilerParams(
            dimension_semantics=("parallel",),
            vmem_limit_bytes=_VMEM_LIMIT,
        ),
    )(beta, emb2)

    return z_flat.reshape(N, D), beta


# --------------------------------------------------------------------------------------
# Public wrapper
# --------------------------------------------------------------------------------------
def attention_forward(embeds, w, b, att, *, force_two_pass=False,
                      score_tile_rows=None, combine_tile_rows=None):
    """embeds: (P, N, D); w: (D, D) PyTorch (out,in) convention; b: (D,); att: (1, D)."""
    P, N, D = embeds.shape
    embeds = embeds.astype(jnp.float32)
    wt = w.T.astype(jnp.float32)                 # kernel computes x @ wt + b == x @ W^T + b
    b2 = b.reshape(1, D).astype(jnp.float32)
    att2 = att.reshape(1, D).astype(jnp.float32)

    if (not force_two_pass) and (P * N * D * 4 <= _FUSED_EMBED_BYTES):
        return _attention_fused(embeds, wt, b2, att2)
    return _attention_two_pass(embeds, wt, b2, att2,
                               score_tile_rows=score_tile_rows,
                               combine_tile_rows=combine_tile_rows)


# --------------------------------------------------------------------------------------
# Self-test
# --------------------------------------------------------------------------------------
if __name__ == "__main__":
    def _reference(embeds, w, b, att):
        h = jnp.tanh(embeds @ w.T + b)           # (P, N, D)
        sp = h.mean(axis=1)                      # (P, D)
        scores = (sp * att).sum(-1)              # (P,)
        beta = jax.nn.softmax(scores)
        z = jnp.einsum("p,pnd->nd", beta, embeds)
        return z, beta

    def _make_inputs(key, P, N, D):
        k_emb, k_w, k_b, k_att = jax.random.split(key, 4)
        embeds = jax.random.normal(k_emb, (P, N, D), dtype=jnp.float32)
        gain = 1.414
        w_std = gain * (2.0 / (D + D)) ** 0.5                    # xavier_normal_ fc.weight
        w = w_std * jax.random.normal(k_w, (D, D), dtype=jnp.float32)
        bound = 1.0 / (D ** 0.5)                                 # default Linear bias init
        b = jax.random.uniform(k_b, (D,), minval=-bound, maxval=bound, dtype=jnp.float32)
        att_std = gain * (2.0 / (1 + D)) ** 0.5                  # xavier_normal_ att
        att = att_std * jax.random.normal(k_att, (1, D), dtype=jnp.float32)
        return embeds, w, b, att

    key = jax.random.PRNGKey(0)
    k1, k2 = jax.random.split(key)

    # 1) fused fast path (small -> embeds resident in VMEM)
    embeds, w, b, att = _make_inputs(k1, 3, 32, 32)
    z, beta = attention_forward(embeds, w, b, att)
    z = jax.block_until_ready(z)
    z_ref, beta_ref = _reference(embeds, w, b, att)
    assert jnp.allclose(beta, beta_ref, atol=1e-5), (beta, beta_ref)
    assert jnp.allclose(z, z_ref, atol=1e-5)

    # 2) two-pass fallback path at the same shapes
    z, beta = attention_forward(embeds, w, b, att, force_two_pass=True)
    z = jax.block_until_ready(z)
    assert jnp.allclose(beta, beta_ref, atol=1e-5), (beta, beta_ref)
    assert jnp.allclose(z, z_ref, atol=1e-5)

    # 3) two-pass with ragged row tiles and non-lane-aligned D (exercises edge handling)
    embeds, w, b, att = _make_inputs(k2, 2, 20, 20)
    z, beta = attention_forward(embeds, w, b, att, force_two_pass=True,
                                score_tile_rows=8, combine_tile_rows=8)
    z = jax.block_until_ready(z)
    z_ref, beta_ref = _reference(embeds, w, b, att)
    assert jnp.allclose(beta, beta_ref, atol=1e-5), (beta, beta_ref)
    assert jnp.allclose(z, z_ref, atol=1e-5)

    print("KERNEL_OK")
</pallas_src>

<mosaic_0001>
module attributes {stable_mosaic.version = 11 : i64} {
  func.func @kernel(%arg0: memref<3x32x32xf32, #tpu.memory_space<vmem>>, %arg1: memref<32x32xf32, #tpu.memory_space<vmem>>, %arg2: memref<1x32xf32, #tpu.memory_space<vmem>>, %arg3: memref<1x32xf32, #tpu.memory_space<vmem>>, %arg4: memref<32x32xf32, #tpu.memory_space<vmem>>, %arg5: memref<1x128xf32, #tpu.memory_space<vmem>>) attributes {dimension_semantics = [], scalar_prefetch = 0 : i64, scratch_operands = 0 : i64, tpu.core_type = #tpu.core_type<tc>} {
    %c0 = arith.constant 0 : index
    %c0_0 = arith.constant 0 : index
    %c0_1 = arith.constant 0 : index
    %0 = vector.load %arg0[%c0, %c0_0, %c0_1] : memref<3x32x32xf32, #tpu.memory_space<vmem>>, vector<1x32x32xf32>
    %1 = vector.shape_cast %0 : vector<1x32x32xf32> to vector<32x32xf32>
    %c0_2 = arith.constant 0 : index
    %c0_3 = arith.constant 0 : index
    %2 = vector.load %arg1[%c0_2, %c0_3] : memref<32x32xf32, #tpu.memory_space<vmem>>, vector<32x32xf32>
    %cst = arith.constant dense<0.000000e+00> : vector<32x32xf32>
    %3 = tpu.matmul %1, %2, %cst {dimension_numbers = #tpu.dot_dimension_numbers<[1], [0], [0], [1], [0, 0, 1, 1], [], []>} : vector<32x32xf32>, vector<32x32xf32>, vector<32x32xf32> -> vector<32x32xf32>
    %c0_4 = arith.constant 0 : index
    %c0_5 = arith.constant 0 : index
    %4 = vector.load %arg2[%c0_4, %c0_5] : memref<1x32xf32, #tpu.memory_space<vmem>>, vector<1x32xf32>
    %5 = vector.broadcast %4 : vector<1x32xf32> to vector<32x32xf32>
    %6 = arith.addf %3, %5 : vector<32x32xf32>
    %7 = math.tanh %6 : vector<32x32xf32>
    %c0_6 = arith.constant 0 : index
    %c0_7 = arith.constant 0 : index
    %8 = vector.load %arg3[%c0_6, %c0_7] : memref<1x32xf32, #tpu.memory_space<vmem>>, vector<1x32xf32>
    %9 = vector.broadcast %8 : vector<1x32xf32> to vector<32x32xf32>
    %10 = arith.mulf %7, %9 : vector<32x32xf32>
    %cst_8 = arith.constant dense<0.000000e+00> : vector<32xf32>
    %11 = vector.multi_reduction <add>, %10, %cst_8 [0] : vector<32x32xf32> to vector<32xf32>
    %12 = vector.shape_cast %11 : vector<32xf32> to vector<1x32xf32>
    %cst_9 = arith.constant dense<0.000000e+00> : vector<1xf32>
    %13 = vector.multi_reduction <add>, %12, %cst_9 [1] : vector<1x32xf32> to vector<1xf32>
    %14 = vector.shape_cast %13 : vector<1xf32> to vector<1x1xf32>
    %cst_10 = arith.constant 3.125000e-02 : f32
    %15 = vector.broadcast %cst_10 : f32 to vector<1x1xf32>
    %16 = arith.mulf %14, %15 : vector<1x1xf32>
    %c1 = arith.constant 1 : index
    %c0_11 = arith.constant 0 : index
    %c0_12 = arith.constant 0 : index
    %17 = vector.load %arg0[%c1, %c0_11, %c0_12] : memref<3x32x32xf32, #tpu.memory_space<vmem>>, vector<1x32x32xf32>
    %18 = vector.shape_cast %17 : vector<1x32x32xf32> to vector<32x32xf32>
    %c0_13 = arith.constant 0 : index
    %c0_14 = arith.constant 0 : index
    %19 = vector.load %arg1[%c0_13, %c0_14] : memref<32x32xf32, #tpu.memory_space<vmem>>, vector<32x32xf32>
    %cst_15 = arith.constant dense<0.000000e+00> : vector<32x32xf32>
    %20 = tpu.matmul %18, %19, %cst_15 {dimension_numbers = #tpu.dot_dimension_numbers<[1], [0], [0], [1], [0, 0, 1, 1], [], []>} : vector<32x32xf32>, vector<32x32xf32>, vector<32x32xf32> -> vector<32x32xf32>
    %c0_16 = arith.constant 0 : index
    %c0_17 = arith.constant 0 : index
    %21 = vector.load %arg2[%c0_16, %c0_17] : memref<1x32xf32, #tpu.memory_space<vmem>>, vector<1x32xf32>
    %22 = vector.broadcast %21 : vector<1x32xf32> to vector<32x32xf32>
    %23 = arith.addf %20, %22 : vector<32x32xf32>
    %24 = math.tanh %23 : vector<32x32xf32>
    %c0_18 = arith.constant 0 : index
    %c0_19 = arith.constant 0 : index
    %25 = vector.load %arg3[%c0_18, %c0_19] : memref<1x32xf32, #tpu.memory_space<vmem>>, vector<1x32xf32>
    %26 = vector.broadcast %25 : vector<1x32xf32> to vector<32x32xf32>
    %27 = arith.mulf %24, %26 : vector<32x32xf32>
    %cst_20 = arith.constant dense<0.000000e+00> : vector<32xf32>
    %28 = vector.multi_reduction <add>, %27, %cst_20 [0] : vector<32x32xf32> to vector<32xf32>
    %29 = vector.shape_cast %28 : vector<32xf32> to vector<1x32xf32>
    %cst_21 = arith.constant dense<0.000000e+00> : vector<1xf32>
    %30 = vector.multi_reduction <add>, %29, %cst_21 [1] : vector<1x32xf32> to vector<1xf32>
    %31 = vector.shape_cast %30 : vector<1xf32> to vector<1x1xf32>
    %cst_22 = arith.constant 3.125000e-02 : f32
    %32 = vector.broadcast %cst_22 : f32 to vector<1x1xf32>
    %33 = arith.mulf %31, %32 : vector<1x1xf32>
    %c2 = arith.constant 2 : index
    %c0_23 = arith.constant 0 : index
    %c0_24 = arith.constant 0 : index
    %34 = vector.load %arg0[%c2, %c0_23, %c0_24] : memref<3x32x32xf32, #tpu.memory_space<vmem>>, vector<1x32x32xf32>
    %35 = vector.shape_cast %34 : vector<1x32x32xf32> to vector<32x32xf32>
    %c0_25 = arith.constant 0 : index
    %c0_26 = arith.constant 0 : index
    %36 = vector.load %arg1[%c0_25, %c0_26] : memref<32x32xf32, #tpu.memory_space<vmem>>, vector<32x32xf32>
    %cst_27 = arith.constant dense<0.000000e+00> : vector<32x32xf32>
    %37 = tpu.matmul %35, %36, %cst_27 {dimension_numbers = #tpu.dot_dimension_numbers<[1], [0], [0], [1], [0, 0, 1, 1], [], []>} : vector<32x32xf32>, vector<32x32xf32>, vector<32x32xf32> -> vector<32x32xf32>
    %c0_28 = arith.constant 0 : index
    %c0_29 = arith.constant 0 : index
    %38 = vector.load %arg2[%c0_28, %c0_29] : memref<1x32xf32, #tpu.memory_space<vmem>>, vector<1x32xf32>
    %39 = vector.broadcast %38 : vector<1x32xf32> to vector<32x32xf32>
    %40 = arith.addf %37, %39 : vector<32x32xf32>
    %41 = math.tanh %40 : vector<32x32xf32>
    %c0_30 = arith.constant 0 : index
    %c0_31 = arith.constant 0 : index
    %42 = vector.load %arg3[%c0_30, %c0_31] : memref<1x32xf32, #tpu.memory_space<vmem>>, vector<1x32xf32>
    %43 = vector.broadcast %42 : vector<1x32xf32> to vector<32x32xf32>
    %44 = arith.mulf %41, %43 : vector<32x32xf32>
    %cst_32 = arith.constant dense<0.000000e+00> : vector<32xf32>
    %45 = vector.multi_reduction <add>, %44, %cst_32 [0] : vector<32x32xf32> to vector<32xf32>
    %46 = vector.shape_cast %45 : vector<32xf32> to vector<1x32xf32>
    %cst_33 = arith.constant dense<0.000000e+00> : vector<1xf32>
    %47 = vector.multi_reduction <add>, %46, %cst_33 [1] : vector<1x32xf32> to vector<1xf32>
    %48 = vector.shape_cast %47 : vector<1xf32> to vector<1x1xf32>
    %cst_34 = arith.constant 3.125000e-02 : f32
    %49 = vector.broadcast %cst_34 : f32 to vector<1x1xf32>
    %50 = arith.mulf %48, %49 : vector<1x1xf32>
    %51 = arith.maximumf %16, %33 : vector<1x1xf32>
    %52 = arith.maximumf %51, %50 : vector<1x1xf32>
    %53 = arith.subf %16, %52 : vector<1x1xf32>
    %54 = math.exp %53 : vector<1x1xf32>
    %55 = arith.subf %33, %52 : vector<1x1xf32>
    %56 = math.exp %55 : vector<1x1xf32>
    %57 = arith.subf %50, %52 : vector<1x1xf32>
    %58 = math.exp %57 : vector<1x1xf32>
    %59 = arith.addf %54, %56 : vector<1x1xf32>
    %60 = arith.addf %59, %58 : vector<1x1xf32>
    %61 = arith.divf %54, %60 : vector<1x1xf32>
    %62 = arith.divf %56, %60 : vector<1x1xf32>
    %63 = arith.divf %58, %60 : vector<1x1xf32>
    %c0_35 = arith.constant 0 : index
    %c0_36 = arith.constant 0 : index
    %c0_37 = arith.constant 0 : index
    %64 = vector.load %arg0[%c0_35, %c0_36, %c0_37] : memref<3x32x32xf32, #tpu.memory_space<vmem>>, vector<1x32x32xf32>
    %65 = vector.shape_cast %64 : vector<1x32x32xf32> to vector<32x32xf32>
    %66 = vector.broadcast %61 : vector<1x1xf32> to vector<32x32xf32>
    %67 = arith.mulf %65, %66 : vector<32x32xf32>
    %c1_38 = arith.constant 1 : index
    %c0_39 = arith.constant 0 : index
    %c0_40 = arith.constant 0 : index
    %68 = vector.load %arg0[%c1_38, %c0_39, %c0_40] : memref<3x32x32xf32, #tpu.memory_space<vmem>>, vector<1x32x32xf32>
    %69 = vector.shape_cast %68 : vector<1x32x32xf32> to vector<32x32xf32>
    %70 = vector.broadcast %62 : vector<1x1xf32> to vector<32x32xf32>
    %71 = arith.mulf %69, %70 : vector<32x32xf32>
    %72 = arith.addf %67, %71 : vector<32x32xf32>
    %c2_41 = arith.constant 2 : index
    %c0_42 = arith.constant 0 : index
    %c0_43 = arith.constant 0 : index
    %73 = vector.load %arg0[%c2_41, %c0_42, %c0_43] : memref<3x32x32xf32, #tpu.memory_space<vmem>>, vector<1x32x32xf32>
    %74 = vector.shape_cast %73 : vector<1x32x32xf32> to vector<32x32xf32>
    %75 = vector.broadcast %63 : vector<1x1xf32> to vector<32x32xf32>
    %76 = arith.mulf %74, %75 : vector<32x32xf32>
    %77 = arith.addf %72, %76 : vector<32x32xf32>
    %c0_44 = arith.constant 0 : index
    %c0_45 = arith.constant 0 : index
    %78 = vector.load %arg4[%c0_44, %c0_45] : memref<32x32xf32, #tpu.memory_space<vmem>>, vector<32x32xf32>
    tpu.vector_store %arg4[%c0_44, %c0_45], %77 {strides = array<i32>} : memref<32x32xf32, #tpu.memory_space<vmem>>, vector<32x32xf32>,
    %79 = tpu.iota {dimensions = array<i32: 1>} : vector<1x128xi32>
    %cst_46 = arith.constant 0.000000e+00 : f32
    %80 = vector.broadcast %cst_46 : f32 to vector<1x128xf32>
    %c0_i32 = arith.constant 0 : i32
    %81 = vector.broadcast %c0_i32 : i32 to vector<1x128xi32>
    %82 = arith.cmpi eq, %79, %81 : vector<1x128xi32>
    %83 = vector.shape_cast %61 : vector<1x1xf32> to vector<1x1xf32>
    %84 = vector.broadcast %83 : vector<1x1xf32> to vector<1x128xf32>
    %85 = arith.select %82, %84, %80 : vector<1x128xi1>, vector<1x128xf32>
    %c1_i32 = arith.constant 1 : i32
    %86 = vector.broadcast %c1_i32 : i32 to vector<1x128xi32>
    %87 = arith.cmpi eq, %79, %86 : vector<1x128xi32>
    %88 = vector.shape_cast %62 : vector<1x1xf32> to vector<1x1xf32>
    %89 = vector.broadcast %88 : vector<1x1xf32> to vector<1x128xf32>
    %90 = arith.select %87, %89, %85 : vector<1x128xi1>, vector<1x128xf32>
    %c2_i32 = arith.constant 2 : i32
    %91 = vector.broadcast %c2_i32 : i32 to vector<1x128xi32>
    %92 = arith.cmpi eq, %79, %91 : vector<1x128xi32>
    %93 = vector.shape_cast %63 : vector<1x1xf32> to vector<1x1xf32>
    %94 = vector.broadcast %93 : vector<1x1xf32> to vector<1x128xf32>
    %95 = arith.select %92, %94, %90 : vector<1x128xi1>, vector<1x128xf32>
    %c0_47 = arith.constant 0 : index
    %c0_48 = arith.constant 0 : index
    %96 = vector.load %arg5[%c0_47, %c0_48] : memref<1x128xf32, #tpu.memory_space<vmem>>, vector<1x128xf32>
    tpu.vector_store %arg5[%c0_47, %c0_48], %95 {strides = array<i32>} : memref<1x128xf32, #tpu.memory_space<vmem>>, vector<1x128xf32>,
    return
  }
}

</mosaic_0001>

<bundles_post_ra>
// kernel: tpu_custom_call.1
= control target key start
LH: loop header
LB: loop body
LE: loop exit
PB: predicated region body
PF: predicated region fallthrough
CT: control target
= control target key end

     0   :  { %11 = vsyncpa [#allocation3], 0  ;;  %s960_s0 = inlined_call_operand.hbm [shape: f32[3,32,32], index: 0, kind: input, shape index: {}]   ;;  %s961_s1 = inlined_call_operand.hbm [shape: f32[32,32], index: 1, kind: input, shape index: {}]   ;;  %s962_s2 = inlined_call_operand.vmem [shape: f32[1,32], index: 2, kind: input, shape index: {}]   ;;  %s963_s3 = inlined_call_operand.vmem [shape: f32[1,32], index: 3, kind: input, shape index: {}]   ;;  %s964_s4 = inlined_call_operand.hbm [shape: f32[32,32], index: 4, kind: output, shape index: {0}]   ;;  %s965_s5 = inlined_call_operand.hbm [shape: f32[1,128], index: 5, kind: output, shape index: {1}]  }
   0x1   :  { %12 = vsyncpa [#allocation6], 0 }
   0x2   :  { %13 = vsyncpa [#allocation4], 0 }
   0x3   :  { %14 = vsyncpa [#allocation9], 0  ;;  %s772_s18 = smov [#allocation2]   ;;  %s676_s22 = scalar_lea.hbm %s960_s0, 1536 }
   0x4   :  { %s20_s19 = sshll.u32 %s772_s18, 4  ;;  %p677_p0 = scmp.ne.s32.totalorder %s960_s0, %s676_s22  ;;  %s21_s19 = int_to_ptr.vmem [resolvable:$true] %s20_s19 }
   0x5   :  { %p680_p1 = scmp.lt.u32.totalorder %s676_s22, %s960_s0 }
   0x7   :  { %p682_p2 = pnand %p680_p1, %p677_p0 }
   0x9   :  { %685 = shalt.err (!%p682_p2)
}
   0xa   :  { %s686_s27 = scalar_lea.vmem %s21_s19, 1536  ;;  %p691_p4 = scmp.lt.s32.totalorder %s21_s19, %s21_s19 }
   0xb   :  { %p687_p3 = scmp.ne.s32.totalorder %s21_s19, %s686_s27  ;;  %p692_p5 = scmp.lt.s32.totalorder %s686_s27, %s686_s27 }
   0xd   :  { %p693_p6 = por %p692_p5, %p691_p4 }
   0xf   :  { %p694_p7 = pnand %p693_p6, %p687_p3 }
  0x11   :  { %697 = shalt.err (!%p694_p7)
}
  0x12   :  { %s773_s28 = smov 128   ;;  %s774_s29 = smov 8  }
  0x13   :  { %26 = dma.hbm_to_vmem [thread:$0]  %s960_s0, 1536, %s21_s19, [#allocation3], %s773_s28, %s773_s28, %s774_s29  }
  0x14   :  { %s775_s7 = smov [#allocation5]   ;;  %s698_s11 = scalar_lea.hbm %s961_s1, 512 }
  0x15   :  { %s32_s8 = sshll.u32 %s775_s7, 4  ;;  %p699_p8 = scmp.ne.s32.totalorder %s961_s1, %s698_s11  ;;  %s33_s8 = int_to_ptr.vmem [resolvable:$true] %s32_s8 }
  0x16   :  { %p702_p9 = scmp.lt.u32.totalorder %s698_s11, %s961_s1 }
  0x18   :  { %p704_p10 = pnand %p702_p9, %p699_p8 }
  0x1a   :  { %707 = shalt.err (!%p704_p10)
}
  0x1b   :  { %s708_s16 = scalar_lea.vmem %s33_s8, 512  ;;  %p713_p12 = scmp.lt.s32.totalorder %s33_s8, %s33_s8 }
  0x1c   :  { %p709_p11 = scmp.ne.s32.totalorder %s33_s8, %s708_s16  ;;  %p714_p13 = scmp.lt.s32.totalorder %s708_s16, %s708_s16 }
  0x1e   :  { %p715_p0 = por %p714_p13, %p713_p12 }
  0x20   :  { %p716_p1 = pnand %p715_p0, %p709_p11 }
  0x22   :  { %719 = shalt.err (!%p716_p1)
}
  0x23   :  { %38 = dma.hbm_to_vmem [thread:$0]  %s961_s1, 512, %s33_s8, [#allocation6], %s773_s28, %s773_s28, %s774_s29  }
  0x24   :  { %764 = dma.done.wait [#allocation3], 1536  }
  0x25   :  { %765 = vsyncadd [#allocation3], 4294965760 }
  0x26   :  { %766 = dma.done.wait [#allocation6], 512  }
  0x27   :  { %767 = vsyncadd [#allocation6], 4294966784  ;;  %vm64_vm0 = vcmask 261120   ;;  %v53_v0 = vld [vmem:[#allocation5] sm:$0xff]  ;;  %v54_v1 = vld [vmem:[#allocation5 + $0x8] sm:$0xff]  ;;  %s777_s21 = smov [#allocation8]  }
  0x28   :  { %v55_v2 = vld [vmem:[#allocation5 + $0x10] sm:$0xff]  ;;  %v610_v3 = vpack.c.bf16 %v54_v1, %v53_v0  ;;  %v56_v4 = vld [vmem:[#allocation5 + $0x18] sm:$0xff]  ;;  %v838_v5 = vld [vmem:[#allocation2] sm:$0xff]  ;;  %s516_s22 = sshll.u32 %s777_s21, 4  ;;  %s921_s22 = int_to_ptr.vmem [resolvable:$true] %s516_s22 }
  0x29   :  { %v840_v6 = vld [vmem:[#allocation2 + $0x20] sm:$0xff]  ;;  %v614_v7 = vpack.c.bf16 %v56_v4, %v55_v2  ;;  %576 = vmatprep.mubr.msk.f32.mxu0 %vm64_vm0, %v838_v5  ;;  %v846_v8 = vld [vmem:[#allocation2 + $0x8] sm:$0xff]  ;;  %v850_v10 = vld [vmem:[#allocation2 + $0x10] sm:$0xff] }
  0x2a   :  { %590 = vmatprep.mubr.msk.f32.mxu1 %vm64_vm0, %v840_v6  ;;  %611 = vmatprep.subr.bf16.mxu0 %v610_v3  ;;  %v848_v9 = vld [vmem:[#allocation2 + $0x28] sm:$0xff]  ;;  %v852_v11 = vld [vmem:[#allocation2 + $0x30] sm:$0xff]  ;;  %v860_v12 = vld [vmem:[#allocation2 + $0x18] sm:$0xff] }
  0x2b   :  { %619 = vmatprep.subr.bf16.mxu1 %v610_v3  ;;  %613 = vmatpush3.bf16.msra.mxu0 %v610_v3  ;;  %v862_v13 = vld [vmem:[#allocation2 + $0x38] sm:$0xff]  ;;  %v866_v14 = vld [vmem:[#allocation2 + $0x40] sm:$0xff]  ;;  %v868_v15 = vld [vmem:[#allocation2 + $0x50] sm:$0xff] }
  0x2c   :  { %621 = vmatpush3.bf16.msra.mxu1 %v610_v3  ;;  %615 = vmatprep.subr.bf16.mxu0 %v614_v7  ;;  %v876_v16 = vld [vmem:[#allocation2 + $0x48] sm:$0xff]  ;;  %v880_v17 = vld [vmem:[#allocation2 + $0x58] sm:$0xff]  ;;  %v530_v18 = vld [vmem:[%s962_s2] ss:$0 sm:$0xff] }
  0x2d   :  { %623 = vmatprep.subr.bf16.mxu1 %v614_v7  ;;  %v535_v42 = vld [vmem:[%s963_s3] ss:$0 sm:$0xff]  ;;  %s776_s3 = smov [#allocation7]  }
  0x2e   :  { %s503_s20 = sshll.u32 %s776_s3, 4  ;;  %s504_s20 = int_to_ptr.vmem [resolvable:$true] %s503_s20 }
  0x2f   :  { %617 = vmatpush3.bf16.msra.mxu0 %v614_v7  ;;  %s720_s23 = scalar_lea.vmem %s504_s20, 512  ;;  %p725_p3 = scmp.lt.s32.totalorder %s504_s20, %s504_s20 }
  0x30   :  { %625 = vmatpush3.bf16.msra.mxu1 %v614_v7  ;;  %627 = vmatprep.subr.bf16.mxu0 %v610_v3  ;;  %p721_p2 = scmp.ne.s32.totalorder %s504_s20, %s720_s23  ;;  %p726_p4 = scmp.lt.s32.totalorder %s720_s23, %s720_s23 }
  0x31   :  { %634 = vmatprep.subr.bf16.mxu1 %v610_v3 }
  0x32   :  { %577 = vmatmul.mubr.msk.f32.vlgmr.msra.gmra.mrb[0].mxu0 %vm64_vm0, %v846_v8  ;;  %p727_p5 = por %p726_p4, %p725_p3 }
  0x33   :  { %591 = vmatmul.mubr.msk.f32.vlgmr.msra.gmra.mrb[0].mxu1 %vm64_vm0, %v848_v9  ;;  %629 = vmatpush3.bf16.msra.mxu0 %v610_v3 }
  0x34   :  { %579 = vmatprep.mubr.msk.f32.mxu0 %vm64_vm0, %v850_v10  ;;  %593 = vmatprep.mubr.msk.f32.mxu1 %vm64_vm0, %v852_v11  ;;  %p728_p6 = pnand %p727_p5, %p721_p2 }
  0x35   :  { %636 = vmatpush3.bf16.msra.mxu1 %v610_v3  ;;  %631 = vmatprep.subr.bf16.mxu0 %v614_v7 }
  0x36   :  { %635 = vmatprep.subr.bf16.mxu1 %v614_v7  ;;  %580 = vmatmul.mubr.msk.f32.gmra.mrb[2].mxu0 %vm64_vm0, %v860_v12 }
  0x37   :  { %594 = vmatmul.mubr.msk.f32.gmra.mrb[2].mxu1 %vm64_vm0, %v862_v13  ;;  %633 = vmatpush3.bf16.msra.mxu0 %v614_v7 }
  0x38   :  { %604 = vmatprep.mubr.msk.f32.mxu0 %vm64_vm0, %v866_v14  ;;  %607 = vmatprep.mubr.msk.f32.mxu1 %vm64_vm0, %v868_v15 }
  0x39   :  { %637 = vmatpush3.bf16.msra.mxu1 %v614_v7 }
  0x3a   :  { %605 = vmatmul.mubr.msk.f32.vlgmr.msra.gmra.mrb[4].mxu0 %vm64_vm0, %v876_v16 }
  0x3c   :  { %608 = vmatmul.mubr.msk.f32.vlgmr.msra.gmra.mrb[4].mxu1 %vm64_vm0, %v880_v17 }
 0x105   :  { %v578_v19 = vpop.f32.mrb[0].mxu0 }
 0x106   :  { %v592_v20 = vpop.f32.mrb[0].mxu1  ;;  %v149_v21 = vadd.f32 %v578_v19, %v530_v18  ;;  %v143_v22 = vpop.f32.mrb[1].mxu0 }
 0x107   :  { %v283_v23 = vadd.f32 %v592_v20, %v530_v18  ;;  %v277_v24 = vpop.f32.mrb[1].mxu1  ;;  %v144_v25 = vadd.f32 %v530_v18, %v143_v22 }
 0x108   :  { %v278_v26 = vadd.f32 %v530_v18, %v277_v24  ;;  %644 = vtanh.f32 %v149_v21 }
 0x109   :  { %646 = vtanh.f32 %v144_v25  ;;  %v581_v27 = vpop.f32.mrb[2].mxu0 }
 0x10a   :  { %v595_v28 = vpop.f32.mrb[2].mxu1  ;;  %648 = vtanh.f32 %v283_v23  ;;  %v159_v29 = vadd.f32 %v581_v27, %v530_v18  ;;  %v153_v31 = vpop.f32.mrb[3].mxu0 }
 0x10b   :  { %v293_v30 = vadd.f32 %v595_v28, %v530_v18  ;;  %v287_v32 = vpop.f32.mrb[3].mxu1  ;;  %650 = vtanh.f32 %v278_v26  ;;  %v154_v33 = vadd.f32 %v530_v18, %v153_v31 }
 0x10c   :  { %v288_v34 = vadd.f32 %v530_v18, %v287_v32  ;;  %652 = vtanh.f32 %v159_v29 }
 0x10d   :  { %654 = vtanh.f32 %v293_v30  ;;  %v606_v35 = vpop.f32.mrb[4].mxu0 }
 0x10e   :  { %656 = vtanh.f32 %v154_v33  ;;  %v410_v36 = vadd.f32 %v606_v35, %v530_v18  ;;  %v404_v37 = vpop.f32.mrb[5].mxu0 }
 0x10f   :  { %v609_v38 = vpop.f32.mrb[4].mxu1  ;;  %658 = vtanh.f32 %v288_v34  ;;  %v405_v39 = vadd.f32 %v530_v18, %v404_v37 }
 0x110   :  { %v420_v40 = vadd.f32 %v609_v38, %v530_v18  ;;  %v414_v41 = vpop.f32.mrb[5].mxu1  ;;  %660 = vtanh.f32 %v410_v36 }
 0x111   :  { %v415_v43 = vadd.f32 %v530_v18, %v414_v41  ;;  %662 = vtanh.f32 %v405_v39 }
 0x112   :  { %v645_v44 = vpop.eup %644  ;;  %664 = vtanh.f32 %v420_v40 }
 0x113   :  { %v647_v45 = vpop.eup %646  ;;  %v174_v46 = vmul.f32 %v645_v44, %v535_v42  ;;  %666 = vtanh.f32 %v415_v43 }
 0x114   :  { %v649_v47 = vpop.eup %648  ;;  %v173_v48 = vmul.f32 %v647_v45, %v535_v42 }
 0x115   :  { %v651_v49 = vpop.eup %650  ;;  %v301_v50 = vmul.f32 %v649_v47, %v535_v42  ;;  %v178_v51 = vsel %vm64_vm0, %v174_v46, 0.0 }
 0x116   :  { %v653_v52 = vpop.eup %652  ;;  %v300_v53 = vmul.f32 %v651_v49, %v535_v42  ;;  %v177_v54 = vsel %vm64_vm0, %v173_v48, 0.0 }
 0x117   :  { %v655_v55 = vpop.eup %654  ;;  %v179_v56 = vadd.f32 %v178_v51, %v177_v54  ;;  %v305_v57 = vsel %vm64_vm0, %v301_v50, 0.0  ;;  %v176_v63 = vmul.f32 %v653_v52, %v535_v42 }
 0x118   :  { %v657_v58 = vpop.eup %656  ;;  %v303_v59 = vmul.f32 %v655_v55, %v535_v42  ;;  %v304_v60 = vsel %vm64_vm0, %v300_v53, 0.0 }
 0x119   :  { %v659_v61 = vpop.eup %658  ;;  %v175_v62 = vmul.f32 %v657_v58, %v535_v42  ;;  %v306_v0 = vadd.f32 %v305_v57, %v304_v60  ;;  %v182_v24 = vsel %vm64_vm0, %v176_v63, 0.0 }
 0x11a   :  { %v661_v1 = vpop.eup %660  ;;  %v302_v2 = vmul.f32 %v659_v61, %v535_v42  ;;  %v309_v22 = vsel %vm64_vm0, %v303_v59, 0.0 }
 0x11b   :  { %v663_v3 = vpop.eup %662  ;;  %v428_v4 = vmul.f32 %v661_v1, %v535_v42  ;;  %v180_v7 = vsel %vm64_vm0, %v175_v62, 0.0 }
 0x11c   :  { %v665_v18 = vpop.eup %664  ;;  %v427_v19 = vmul.f32 %v663_v3, %v535_v42  ;;  %v181_v20 = vadd.f32 %v180_v7, %v179_v56  ;;  %v307_v21 = vsel %vm64_vm0, %v302_v2, 0.0 }
 0x11d   :  { %v667_v23 = vpop.eup %666  ;;  %v308_v25 = vadd.f32 %v307_v21, %v306_v0  ;;  %v432_v26 = vsel %vm64_vm0, %v428_v4, 0.0  ;;  %v430_v29 = vmul.f32 %v665_v18, %v535_v42 }
 0x11e   :  { %v429_v27 = vmul.f32 %v667_v23, %v535_v42  ;;  %v183_v28 = vadd.f32 %v182_v24, %v181_v20  ;;  %v431_v30 = vsel %vm64_vm0, %v427_v19, 0.0 }
 0x11f   :  { %v310_v31 = vadd.f32 %v309_v22, %v308_v25  ;;  %v433_v32 = vadd.f32 %v432_v26, %v431_v30  ;;  %v436_v38 = vsel %vm64_vm0, %v430_v29, 0.0  ;;  %v489_v25 = vlaneseq }
 0x120   :  { %v184_v33 = vrot.slane %v183_v28, 4  ;;  %v434_v34 = vsel %vm64_vm0, %v429_v27, 0.0 }
 0x121   :  { %v311_v35 = vrot.slane %v310_v31, 4  ;;  %v435_v36 = vadd.f32 %v434_v34, %v433_v32  ;;  %v490_v26 = vand.u32 127, %v489_v25 }
 0x122   :  { %v185_v37 = vadd.f32 %v184_v33, %v183_v28 }
 0x123   :  { %v312_v39 = vadd.f32 %v311_v35, %v310_v31  ;;  %v437_v40 = vadd.f32 %v436_v38, %v435_v36  ;;  %vm491_vm1 = vcmp.eq.s32.totalorder %v490_v26, 0  ;;  %vm493_vm2 = vcmp.eq.s32.totalorder %v490_v26, 1 }
 0x124   :  { %v186_v41 = vrot.slane %v185_v37, 2  ;;  %vm495_vm3 = vcmp.eq.s32.totalorder %v490_v26, 2 }
 0x125   :  { %v313_v43 = vrot.slane %v312_v39, 2  ;;  %v438_v44 = vrot.slane %v437_v40, 4 }
 0x126   :  { %v187_v45 = vadd.f32 %v186_v41, %v185_v37 }
 0x127   :  { %v314_v46 = vadd.f32 %v313_v43, %v312_v39  ;;  %v439_v42 = vadd.f32 %v438_v44, %v437_v40 }
 0x128   :  { %v188_v47 = vrot.slane %v187_v45, 1 }
 0x129   :  { %v315_v48 = vrot.slane %v314_v46, 1  ;;  %v440_v49 = vrot.slane %v439_v42, 2 }
 0x12a   :  { %v189_v50 = vadd.f32 %v188_v47, %v187_v45 }
 0x12b   :  { %v441_v51 = vadd.f32 %v440_v49, %v439_v42  ;;  %v316_v53 = vadd.f32 %v315_v48, %v314_v46 }
 0x12c   :  { %v190_v52 = vsel %vm64_vm0, %v189_v50, 0.0 }
 0x12d   :  { %191 = vadd.xlane.f32.xlu0 %v190_v52  ;;  %v442_v54 = vrot.slane %v441_v51, 1  ;;  %v317_v56 = vsel %vm64_vm0, %v316_v53, 0.0 }
 0x12f   :  { %v443_v55 = vadd.f32 %v442_v54, %v441_v51 }
 0x131   :  { %318 = vadd.xlane.f32.xlu0 %v317_v56  ;;  %v444_v57 = vsel %vm64_vm0, %v443_v55, 0.0 }
 0x132   :  { %445 = vadd.xlane.f32.xlu1 %v444_v57 }
 0x1ba   :  { %v192_v58 = vpop.xlane.xlu0 %191 }
 0x1bb   :  { %v193_v60 = vmul.f32 0.03125, %v192_v58 }
 0x1be   :  { %v319_v59 = vpop.xlane.xlu0 %318 }
 0x1bf   :  { %v320_v61 = vmul.f32 0.03125, %v319_v59  ;;  %v446_v62 = vpop.xlane.xlu1 %445 }
 0x1c0   :  { %v447_v63 = vmul.f32 0.03125, %v446_v62 }
 0x1c1   :  { %v448_v0 = vmax.f32 %v193_v60, %v320_v61 }
 0x1c3   :  { %v449_v1 = vmax.f32 %v448_v0, %v447_v63 }
 0x1c5   :  { %v450_v2 = vsub.f32 %v193_v60, %v449_v1  ;;  %v453_v3 = vsub.f32 %v320_v61, %v449_v1  ;;  %v456_v4 = vsub.f32 %v447_v63, %v449_v1 }
 0x1c7   :  { %v451_v7 = vmul.f32 1.442695, %v450_v2  ;;  %v454_v18 = vmul.f32 1.442695, %v453_v3  ;;  %v457_v19 = vmul.f32 1.442695, %v456_v4 }
 0x1c9   :  { %668 = vpow2.f32 %v451_v7 }
 0x1ca   :  { %670 = vpow2.f32 %v454_v18 }
 0x1cb   :  { %672 = vpow2.f32 %v457_v19 }
 0x1d3   :  { %v669_v20 = vpop.eup %668 }
 0x1d4   :  { %v671_v21 = vpop.eup %670 }
 0x1d5   :  { %v459_v22 = vadd.f32 %v671_v21, %v669_v20  ;;  %v673_v23 = vpop.eup %672 }
 0x1d7   :  { %v460_v24 = vadd.f32 %v673_v23, %v459_v22 }
 0x1d9   :  { %674 = vrcp.f32 %v460_v24 }
 0x1e3   :  { %v675_v27 = vpop.eup %674 }
 0x1e4   :  { %v462_v28 = vmul.f32 %v675_v27, %v669_v20  ;;  %v463_v29 = vmul.f32 %v675_v27, %v671_v21  ;;  %v464_v30 = vmul.f32 %v675_v27, %v673_v23 }
 0x1e6   :  { %v465_v31 = vmul.f32 %v462_v28, %v838_v5  ;;  %v466_v32 = vmul.f32 %v462_v28, %v846_v8  ;;  %v467_v33 = vmul.f32 %v462_v28, %v850_v10  ;;  %v468_v34 = vmul.f32 %v462_v28, %v860_v12 }
 0x1e7   :  { %v469_v35 = vmul.f32 %v463_v29, %v840_v6  ;;  %v470_v36 = vmul.f32 %v463_v29, %v848_v9  ;;  %v471_v37 = vmul.f32 %v463_v29, %v852_v11  ;;  %v472_v38 = vmul.f32 %v463_v29, %v862_v13 }
 0x1e8   :  { %v477_v39 = vmul.f32 %v464_v30, %v866_v14  ;;  %v478_v40 = vmul.f32 %v464_v30, %v876_v16  ;;  %v479_v5 = vmul.f32 %v464_v30, %v868_v15  ;;  %v480_v8 = vmul.f32 %v464_v30, %v880_v17 }
 0x1e9   :  { %v473_v10 = vadd.f32 %v469_v35, %v465_v31  ;;  %v474_v12 = vadd.f32 %v470_v36, %v466_v32  ;;  %v475_v41 = vadd.f32 %v471_v37, %v467_v33  ;;  %v476_v6 = vadd.f32 %v472_v38, %v468_v34 }
 0x1ea   :  { %v492_v9 = vsel %vm491_vm1, %v462_v28, 0.0 }
 0x1eb   :  { %v481_v11 = vadd.f32 %v477_v39, %v473_v10  ;;  %v482_v13 = vadd.f32 %v478_v40, %v474_v12  ;;  %v483_v14 = vadd.f32 %v479_v5, %v475_v41  ;;  %v484_v43 = vadd.f32 %v480_v8, %v476_v6 }
 0x1ec   :  { %v494_v15 = vsel %vm493_vm2, %v463_v29, %v492_v9 }
 0x1ed   :  { %485 = vst.msk [vmem:[#allocation7] sm:$0xff] %vm64_vm0, %v481_v11  ;;  %486 = vst.msk [vmem:[#allocation7 + $0x8] sm:$0xff] %vm64_vm0, %v482_v13  ;;  %v496_v16 = vsel %vm495_vm3, %v464_v30, %v494_v15 }
 0x1ee   :  { %487 = vst.msk [vmem:[#allocation7 + $0x10] sm:$0xff] %vm64_vm0, %v483_v14  ;;  %488 = vst.msk [vmem:[#allocation7 + $0x18] sm:$0xff] %vm64_vm0, %v484_v43 }
 0x1ef   :  { %731 = shalt.err (!%p728_p6)
}
 0x1f0   :  { %s732_s26 = scalar_lea.hbm %s964_s4, 512 }
 0x1f1   :  { %p733_p7 = scmp.ne.s32.totalorder %s964_s4, %s732_s26  ;;  %p736_p8 = scmp.lt.u32.totalorder %s732_s26, %s964_s4 }
 0x1f3   :  { %p738_p9 = pnand %p736_p8, %p733_p7 }
 0x1f5   :  { %741 = shalt.err (!%p738_p9)
}
 0x1f6   :  { %509 = dma.vmem_to_hbm [thread:$0]  %s504_s20, 512, %s964_s4, [#allocation4], %s773_s28, %s773_s28, %s774_s29   ;;  %497 = vst [vmem:[#allocation8] sm:$0x1] %v496_v16 }
 0x1f7   :  { %s742_s10 = scalar_lea.vmem %s921_s22, 16  ;;  %s746_s11 = scalar_lea.vmem %s921_s22, 32 }
 0x1f8   :  { %p743_p10 = scmp.ne.s32.totalorder %s921_s22, %s742_s10  ;;  %p747_p11 = scmp.lt.s32.totalorder %s921_s22, %s921_s22 }
 0x1f9   :  { %p748_p12 = scmp.lt.s32.totalorder %s746_s11, %s742_s10 }
 0x1fb   :  { %p749_p13 = por %p748_p12, %p747_p11 }
 0x1fd   :  { %p750_p0 = pnand %p749_p13, %p743_p10 }
 0x1ff   :  { %753 = shalt.err (!%p750_p0)
}
 0x200   :  { %s754_s14 = scalar_lea.hbm %s965_s5, 16 }
 0x201   :  { %p755_p1 = scmp.ne.s32.totalorder %s965_s5, %s754_s14  ;;  %p758_p2 = scmp.lt.u32.totalorder %s754_s14, %s965_s5 }
 0x203   :  { %p760_p3 = pnand %p758_p2, %p755_p1 }
 0x205   :  { %763 = shalt.err (!%p760_p3)
}
 0x206   :  { %519 = dma.vmem_to_hbm [thread:$0]  %s921_s22, 16, %s965_s5, [#allocation9]  }
 0x207   :  { %768 = dma.done.wait [#allocation4], 512  }
 0x208   :  { %769 = vsyncadd [#allocation4], 4294966784 }
 0x209   :  { %770 = dma.done.wait [#allocation9], 16  }
 0x20a   :  { %771 = vsyncadd [#allocation9], 4294967280 }
 0x20b   :  { %526 = vsyncpa [#allocation3], 1 }
 0x20c   :  { %527 = vsyncpa [#allocation6], 1 }
 0x20d   :  { %528 = vsyncpa [#allocation4], 1 }
 0x20e   :  { %529 = vsyncpa [#allocation9], 1 }

</bundles_post_ra>
